<compile_context>
chip_gen: v5e
topology: v5e:2x2
jax: 0.10.0
libtpu: 0.0.40
codegen_flags: <defaults>
</compile_context>

<pallas_src>
import jax
import jax.numpy as jnp
from jax.experimental import pallas as pl
from jax.experimental.pallas import tpu as pltpu

_IGNORE_INDEX = -100                    # F.nll_loss default
_TILE_BYTE_BUDGET = 2 * 1024 * 1024     # per input tile (Pallas double-buffers it)


def _make_svdd_kernel(n_rows, tile_rows, tiles_per_split, ignore_index):
    def kernel(inp_ref, tgt_ref, sum_ref, cnt_ref, acc_ref, cnt_acc_ref):
        i = pl.program_id(1)                          # row-tile (reduction) axis

        @pl.when(i == 0)
        def _init():
            acc_ref[...] = jnp.zeros_like(acc_ref)
            cnt_acc_ref[...] = jnp.zeros_like(cnt_acc_ref)

        x = inp_ref[...]                              # (TN, C) f32 log-probs
        tgt = tgt_ref[...]                            # (TN, 1) int32 class ids
        tn, c = x.shape

        tile_idx = pl.program_id(0) * tiles_per_split + i
        row0 = tile_idx * tile_rows

        class_ids = jax.lax.broadcasted_iota(jnp.int32, (tn, c), 1)
        row_ids = jax.lax.broadcasted_iota(jnp.int32, (tn, 1), 0) + row0
        valid_row = (row_ids < n_rows) & (tgt != ignore_index)    # (TN, 1)
        pick = (class_ids == tgt) & valid_row                     # (TN, C)

        # Steady-state: pure VPU select + add, cross-lane reduce deferred.
        acc_ref[...] += jnp.where(pick, x, 0.0)
        cnt_acc_ref[...] += valid_row.astype(jnp.float32)

        @pl.when(i == pl.num_programs(1) - 1)
        def _finalize():
            sum_ref[0, 0] = jnp.sum(acc_ref[...])
            cnt_ref[0, 0] = jnp.sum(cnt_acc_ref[...])

    return kernel


def svdd_loss(inp, target, kl, beta, train_size, *, tile_rows=None):
    """Pallas implementation of SVDD.forward.

    inp:        (N, C) float32 log-probabilities
    target:     (N,)   int32 class indices (-100 = ignored, as in F.nll_loss)
    kl, beta, train_size: scalars
    Returns (total_loss, nll_loss, kl_loss) as f32 scalars.
    """
    n, c = inp.shape
    inp = inp.astype(jnp.float32)
    tgt2d = target.astype(jnp.int32).reshape(n, 1)

    c_pad = ((c + 127) // 128) * 128

    # Tile size from a VMEM byte budget (largest tile that fits comfortably).
    if n < 8:
        tn = n
    else:
        budget_rows = max(8, (_TILE_BYTE_BUDGET // (c_pad * 4)) // 8 * 8)
        tn = min(budget_rows, (n // 8) * 8)
        if tile_rows is not None:                     # test/tuning override
            tn = max(8, min((tile_rows // 8) * 8, tn))

    total_tiles = -(-n // tn)                         # cdiv
    # 2-way split of the row range across TensorCores (useful on v7x,
    # harmless on single-TC v5e/v6e). Only when it divides evenly.
    n_splits = 2 if (total_tiles >= 2 and total_tiles % 2 == 0) else 1
    tiles_per_split = total_tiles // n_splits

    # Explicit VMEM limit with headroom: 2x double-buffered input+target tiles
    # plus the two scratch accumulators.
    tn_pad = ((tn + 7) // 8) * 8
    inp_tile_bytes = tn_pad * c_pad * 4
    tgt_tile_bytes = tn_pad * 128 * 4                 # (TN,1) int32 pads lanes to 128
    vmem_bytes = 3 * inp_tile_bytes + 3 * tgt_tile_bytes + (2 << 20)
    vmem_bytes = int(min(max(vmem_bytes, 4 << 20), 32 << 20))

    kernel = _make_svdd_kernel(n, tn, tiles_per_split, _IGNORE_INDEX)
    smem = pltpu.MemorySpace.SMEM

    sums, counts = pl.pallas_call(
        kernel,
        out_shape=(
            jax.ShapeDtypeStruct((n_splits, 1), jnp.float32),
            jax.ShapeDtypeStruct((n_splits, 1), jnp.float32),
        ),
        grid=(n_splits, tiles_per_split),
        in_specs=[
            pl.BlockSpec((tn, c), lambda p, i: (p * tiles_per_split + i, 0)),
            pl.BlockSpec((tn, 1), lambda p, i: (p * tiles_per_split + i, 0)),
        ],
        out_specs=(
            pl.BlockSpec((1, 1), lambda p, i: (p, 0), memory_space=smem),
            pl.BlockSpec((1, 1), lambda p, i: (p, 0), memory_space=smem),
        ),
        scratch_shapes=[
            pltpu.VMEM((tn, c), jnp.float32),         # picked-value accumulator
            pltpu.VMEM((tn, 1), jnp.float32),         # valid-row count accumulator
        ],
        compiler_params=pltpu.CompilerParams(
            dimension_semantics=("parallel", "arbitrary"),
            vmem_limit_bytes=vmem_bytes,
        ),
        cost_estimate=pl.CostEstimate(
            flops=2 * n * c,
            transcendentals=0,
            bytes_accessed=n * c * 4 + n * 4 + 8 * n_splits,
        ),
    )(inp, tgt2d)

    # Scalar epilogue in plain JAX (free in XLA).
    picked_sum = jnp.sum(sums)
    valid_count = jnp.sum(counts)
    nll_loss = (-picked_sum / valid_count) * jnp.float32(train_size)
    kl_loss = jnp.float32(beta) * jnp.asarray(kl, jnp.float32)
    total_loss = nll_loss + kl_loss
    return total_loss, nll_loss, kl_loss


if __name__ == "__main__":
    key = jax.random.PRNGKey(0)
    k1, k2, k3, k4 = jax.random.split(key, 4)

    train_size = 1000.0
    beta = 0.1
    kl = 2.5

    # --- case 1: small single-tile problem (matches module usage) ---
    N, C = 8, 32
    logits = jax.random.normal(k1, (N, C), dtype=jnp.float32)
    log_probs = jax.nn.log_softmax(logits, axis=-1)
    target = jax.random.randint(k2, (N,), 0, C, dtype=jnp.int32)

    total, nll, kl_loss = svdd_loss(log_probs, target, kl, beta, train_size)
    jax.block_until_ready((total, nll, kl_loss))

    ref_nll = -jnp.mean(log_probs[jnp.arange(N), target]) * train_size
    ref_kl = beta * kl
    ref_total = ref_nll + ref_kl
    assert jnp.allclose(nll, ref_nll, rtol=1e-5, atol=1e-5)
    assert jnp.allclose(kl_loss, ref_kl, rtol=1e-5, atol=1e-5)
    assert jnp.allclose(total, ref_total, rtol=1e-5, atol=1e-5)

    # --- case 2: multi-tile grid (forced small tile), ragged last tile,
    #             core-split path, and one ignored target (ignore_index=-100) ---
    N2, C2 = 28, 32
    logits2 = jax.random.normal(k3, (N2, C2), dtype=jnp.float32)
    log_probs2 = jax.nn.log_softmax(logits2, axis=-1)
    target2 = jax.random.randint(k4, (N2,), 0, C2, dtype=jnp.int32)
    target2 = target2.at[5].set(-100)

    total2, nll2, kl2 = svdd_loss(log_probs2, target2, kl, beta, train_size,
                                  tile_rows=8)
    jax.block_until_ready((total2, nll2, kl2))

    valid = target2 != -100
    safe_t = jnp.clip(target2, 0, C2 - 1)
    picked = jnp.where(valid, log_probs2[jnp.arange(N2), safe_t], 0.0)
    ref_nll2 = -(picked.sum() / valid.sum()) * train_size
    ref_total2 = ref_nll2 + beta * kl
    assert jnp.allclose(nll2, ref_nll2, rtol=1e-5, atol=1e-5)
    assert jnp.allclose(total2, ref_total2, rtol=1e-5, atol=1e-5)

    print("KERNEL_OK")
</pallas_src>

<mosaic_0001>
module attributes {stable_mosaic.version = 11 : i64} {
  func.func @kernel(%arg0: i32, %arg1: i32, %arg2: memref<8x32xf32, #tpu.memory_space<vmem>>, %arg3: memref<8x1xi32, #tpu.memory_space<vmem>>, %arg4: memref<1x1xf32, #tpu.memory_space<smem>>, %arg5: memref<1x1xf32, #tpu.memory_space<smem>>, %arg6: memref<8x32xf32, #tpu.memory_space<vmem>>, %arg7: memref<8x1xf32, #tpu.memory_space<vmem>>) attributes {dimension_semantics = [#tpu.dimension_semantics<parallel>, #tpu.dimension_semantics<arbitrary>], iteration_bounds = array<i64: 1, 1>, scalar_prefetch = 0 : i64, scratch_operands = 2 : i64, tpu.core_type = #tpu.core_type<tc>, window_params = [{transform_indices = @transform_0, window_bounds = array<i64: 8, 32>}, {transform_indices = @transform_1, window_bounds = array<i64: 8, 1>}, {transform_indices = @transform_2, window_bounds = array<i64: 1, 1>}, {transform_indices = @transform_3, window_bounds = array<i64: 1, 1>}]} {
    %c0_i32 = arith.constant 0 : i32
    %0 = arith.cmpi eq, %arg1, %c0_i32 : i32
    %1 = arith.extui %0 : i1 to i32
    %c0_i32_0 = arith.constant 0 : i32
    %2 = arith.cmpi ne, %1, %c0_i32_0 : i32
    scf.if %2 {
      %cst_15 = arith.constant 0.000000e+00 : f32
      %34 = vector.broadcast %cst_15 : f32 to vector<8x32xf32>
      %c0_16 = arith.constant 0 : index
      %c0_17 = arith.constant 0 : index
      %35 = vector.load %arg6[%c0_16, %c0_17] : memref<8x32xf32, #tpu.memory_space<vmem>>, vector<8x32xf32>
      tpu.vector_store %arg6[%c0_16, %c0_17], %34 {strides = array<i32>} : memref<8x32xf32, #tpu.memory_space<vmem>>, vector<8x32xf32>,
      %cst_18 = arith.constant 0.000000e+00 : f32
      %36 = vector.broadcast %cst_18 : f32 to vector<8x1xf32>
      %c0_19 = arith.constant 0 : index
      %c0_20 = arith.constant 0 : index
      %37 = vector.load %arg7[%c0_19, %c0_20] : memref<8x1xf32, #tpu.memory_space<vmem>>, vector<8x1xf32>
      tpu.vector_store %arg7[%c0_19, %c0_20], %36 {strides = array<i32>} : memref<8x1xf32, #tpu.memory_space<vmem>>, vector<8x1xf32>,
    } else {
    }
    %c0 = arith.constant 0 : index
    %c0_1 = arith.constant 0 : index
    %3 = vector.load %arg2[%c0, %c0_1] : memref<8x32xf32, #tpu.memory_space<vmem>>, vector<8x32xf32>
    %c0_2 = arith.constant 0 : index
    %c0_3 = arith.constant 0 : index
    %4 = vector.load %arg3[%c0_2, %c0_3] : memref<8x1xi32, #tpu.memory_space<vmem>>, vector<8x1xi32>
    %c1_i32 = arith.constant 1 : i32
    %5 = arith.muli %arg0, %c1_i32 : i32
    %6 = arith.addi %5, %arg1 : i32
    %c8_i32 = arith.constant 8 : i32
    %7 = arith.muli %6, %c8_i32 : i32
    %8 = tpu.iota {dimensions = array<i32: 1>} : vector<8x32xi32>
    %9 = tpu.iota {dimensions = array<i32: 0>} : vector<8x1xi32>
    %10 = vector.broadcast %7 : i32 to vector<8x1xi32>
    %11 = arith.addi %9, %10 : vector<8x1xi32>
    %c8_i32_4 = arith.constant 8 : i32
    %12 = vector.broadcast %c8_i32_4 : i32 to vector<8x1xi32>
    %13 = arith.cmpi slt, %11, %12 : vector<8x1xi32>
    %c-100_i32 = arith.constant -100 : i32
    %14 = vector.broadcast %c-100_i32 : i32 to vector<8x1xi32>
    %15 = arith.cmpi ne, %4, %14 : vector<8x1xi32>
    %16 = arith.andi %13, %15 : vector<8x1xi1>
    %17 = vector.broadcast %4 : vector<8x1xi32> to vector<8x32xi32>
    %18 = arith.cmpi eq, %8, %17 : vector<8x32xi32>
    %19 = vector.broadcast %16 : vector<8x1xi1> to vector<8x32xi1>
    %20 = arith.andi %18, %19 : vector<8x32xi1>
    %c0_5 = arith.constant 0 : index
    %c0_6 = arith.constant 0 : index
    %21 = vector.load %arg6[%c0_5, %c0_6] : memref<8x32xf32, #tpu.memory_space<vmem>>, vector<8x32xf32>
    %cst = arith.constant 0.000000e+00 : f32
    %22 = vector.broadcast %cst : f32 to vector<8x32xf32>
    %23 = arith.select %20, %3, %22 : vector<8x32xi1>, vector<8x32xf32>
    %24 = arith.addf %21, %23 : vector<8x32xf32>
    %c0_7 = arith.constant 0 : index
    %c0_8 = arith.constant 0 : index
    %25 = vector.load %arg6[%c0_7, %c0_8] : memref<8x32xf32, #tpu.memory_space<vmem>>, vector<8x32xf32>
    tpu.vector_store %arg6[%c0_7, %c0_8], %24 {strides = array<i32>} : memref<8x32xf32, #tpu.memory_space<vmem>>, vector<8x32xf32>,
    %c0_9 = arith.constant 0 : index
    %c0_10 = arith.constant 0 : index
    %26 = vector.load %arg7[%c0_9, %c0_10] : memref<8x1xf32, #tpu.memory_space<vmem>>, vector<8x1xf32>
    %27 = arith.extui %16 : vector<8x1xi1> to vector<8x1xi32>
    %28 = arith.sitofp %27 : vector<8x1xi32> to vector<8x1xf32>
    %29 = arith.addf %26, %28 : vector<8x1xf32>
    %c0_11 = arith.constant 0 : index
    %c0_12 = arith.constant 0 : index
    %30 = vector.load %arg7[%c0_11, %c0_12] : memref<8x1xf32, #tpu.memory_space<vmem>>, vector<8x1xf32>
    tpu.vector_store %arg7[%c0_11, %c0_12], %29 {strides = array<i32>} : memref<8x1xf32, #tpu.memory_space<vmem>>, vector<8x1xf32>,
    %c0_i32_13 = arith.constant 0 : i32
    %31 = arith.cmpi eq, %arg1, %c0_i32_13 : i32
    %32 = arith.extui %31 : i1 to i32
    %c0_i32_14 = arith.constant 0 : i32
    %33 = arith.cmpi ne, %32, %c0_i32_14 : i32
    scf.if %33 {
      %c0_15 = arith.constant 0 : index
      %c0_16 = arith.constant 0 : index
      %34 = vector.load %arg6[%c0_15, %c0_16] : memref<8x32xf32, #tpu.memory_space<vmem>>, vector<8x32xf32>
      %35 = vector.shape_cast %34 : vector<8x32xf32> to vector<1x8x32xf32>
      %cst_17 = arith.constant dense<0.000000e+00> : vector<1xf32>
      %36 = vector.multi_reduction <add>, %35, %cst_17 [1, 2] : vector<1x8x32xf32> to vector<1xf32>
      %37 = vector.shape_cast %36 : vector<1xf32> to vector<1x1x1xf32>
      %38 = vector.extract %37[0, 0, 0] : f32 from vector<1x1x1xf32>
      %c0_18 = arith.constant 0 : index
      %c0_19 = arith.constant 0 : index
      %39 = memref.load %arg4[%c0_18, %c0_19] : memref<1x1xf32, #tpu.memory_space<smem>>
      memref.store %38, %arg4[%c0_18, %c0_19] : memref<1x1xf32, #tpu.memory_space<smem>>
      %c0_20 = arith.constant 0 : index
      %c0_21 = arith.constant 0 : index
      %40 = vector.load %arg7[%c0_20, %c0_21] : memref<8x1xf32, #tpu.memory_space<vmem>>, vector<8x1xf32>
      %41 = vector.shape_cast %40 : vector<8x1xf32> to vector<1x8x1xf32>
      %cst_22 = arith.constant dense<0.000000e+00> : vector<1xf32>
      %42 = vector.multi_reduction <add>, %41, %cst_22 [1, 2] : vector<1x8x1xf32> to vector<1xf32>
      %43 = vector.shape_cast %42 : vector<1xf32> to vector<1x1x1xf32>
      %44 = vector.extract %43[0, 0, 0] : f32 from vector<1x1x1xf32>
      %c0_23 = arith.constant 0 : index
      %c0_24 = arith.constant 0 : index
      %45 = memref.load %arg5[%c0_23, %c0_24] : memref<1x1xf32, #tpu.memory_space<smem>>
      memref.store %44, %arg5[%c0_23, %c0_24] : memref<1x1xf32, #tpu.memory_space<smem>>
    } else {
    }
    return
  }
  func.func @transform_0(%arg0: i32, %arg1: i32) -> (i32, i32) {
    %c1_i32 = arith.constant 1 : i32
    %0 = arith.muli %arg0, %c1_i32 : i32
    %1 = arith.addi %0, %arg1 : i32
    %c0_i32 = arith.constant 0 : i32
    %c0_i32_0 = arith.constant 0 : i32
    return %1, %c0_i32 : i32, i32
  }
  func.func @transform_1(%arg0: i32, %arg1: i32) -> (i32, i32) {
    %c1_i32 = arith.constant 1 : i32
    %0 = arith.muli %arg0, %c1_i32 : i32
    %1 = arith.addi %0, %arg1 : i32
    %c0_i32 = arith.constant 0 : i32
    %c0_i32_0 = arith.constant 0 : i32
    return %1, %c0_i32 : i32, i32
  }
  func.func @transform_2(%arg0: i32, %arg1: i32) -> (i32, i32) {
    %c0_i32 = arith.constant 0 : i32
    %c0_i32_0 = arith.constant 0 : i32
    return %arg0, %c0_i32 : i32, i32
  }
  func.func @transform_3(%arg0: i32, %arg1: i32) -> (i32, i32) {
    %c0_i32 = arith.constant 0 : i32
    %c0_i32_0 = arith.constant 0 : i32
    return %arg0, %c0_i32 : i32, i32
  }
}

</mosaic_0001>

<bundles_post_ra>
// kernel: tpu_custom_call.1
= control target key start
LH: loop header
LB: loop body
LE: loop exit
PB: predicated region body
PF: predicated region fallthrough
CT: control target
= control target key end

     0   :  { %9 = vsyncpa [#allocation5], 0  ;;  %s240_s0 = inlined_call_operand.vmem [shape: f32[8,32], index: 0, kind: input, shape index: {}]   ;;  %s241_s1 = inlined_call_operand.vmem [shape: s32[8,1], index: 1, kind: input, shape index: {}]   ;;  %s242_s2 = inlined_call_operand.hbm [shape: f32[1,1], index: 2, kind: output, shape index: {0}]   ;;  %s243_s3 = inlined_call_operand.hbm [shape: f32[1,1], index: 3, kind: output, shape index: {1}]  }
   0x1   :  { %v58_v0 = vld [vmem:[%s241_s1] sm:$0xff] }
   0x2   :  { %10 = vsyncpa [#allocation7], 0  ;;  %v198_v1 = vmov 0   ;;  %vm68_vm0 = vcmp.ne.s32.totalorder %v58_v0, 4294967196  ;;  %vm53_vm1 = vcmask 261120   ;;  %v199_v3 = vmov 0.0  }
   0x3   :  { %169 = vset.pattern.permute.xlu0 %v198_v1  ;;  %v74_v2 = vsel %vm68_vm0, 1, %v198_v1  ;;  %54 = vst.msk [vmem:[#allocation2] sm:$0xff] %vm53_vm1, %v199_v3  ;;  %vm55_vm2 = vcmask 7168   ;;  %v160_v4 = vsel %vm68_vm0, 1.0, %v199_v3  ;;  %v61_v8 = vlaneseq  ;;  %v57_v11 = vld [vmem:[%s240_s0] sm:$0xff]  ;;  %s124_s16 = sshll.u32 %s242_s2, 4  ;;  %s125_s16 = int_to_ptr.hbm [resolvable:$true] %s124_s16 }
   0x4   :  { %71 = vperm.xlu0 %169, %v58_v0   ;;  %56 = vst.msk [vmem:[#allocation3] sm:$0xff] %vm55_vm2, %v199_v3  ;;  %s200_s18 = smov [#allocation4]   ;;  %s133_s21 = sshll.u32 %s243_s3, 4  ;;  %s134_s21 = int_to_ptr.hbm [resolvable:$true] %s133_s21 }
   0x5   :  { %v62_v9 = vand.u32 127, %v61_v8  ;;  %s201_s23 = smov [#allocation6]  }
   0xa   :  { %v80_v12 = vld [vmem:[#allocation2] sm:$0xff] }
   0xb   :  { %v85_v5 = vld [vmem:[#allocation3] sm:$0xff] }
   0xc   :  { %76 = vperm.xlu0 %169, %v74_v2   ;;  %v87_v6 = vadd.f32 %v160_v4, %v85_v5 }
   0xe   :  { %89 = vst.msk [vmem:[#allocation3] sm:$0xff] %vm55_vm2, %v87_v6 }
  0x15   :  { %v106_v17 = vld [vmem:[#allocation3] sm:$0xff] }
  0x16   :  { %v107_v18 = vsel %vm55_vm2, %v106_v17, 0.0 }
  0x76   :  { %v72_v7 = vpop.permute.xlu0 %71 }
  0x77   :  { %vm73_vm3 = vcmp.eq.s32.totalorder %v62_v9, %v72_v7 }
  0x7e   :  { %v77_v10 = vpop.permute.xlu0 %76 }
  0x7f   :  { %vm78_vm4 = vcmp.eq.s32.totalorder %v77_v10, 1 }
  0x80   :  { %vm79_vm5 = vmand %vm73_vm3, %vm78_vm4 }
  0x81   :  { %v81_v13 = vsel %vm79_vm5, %v57_v11, 0.0 }
  0x82   :  { %v82_v14 = vadd.f32 %v81_v13, %v80_v12 }
  0x84   :  { %84 = vst.msk [vmem:[#allocation2] sm:$0xff] %vm53_vm1, %v82_v14 }
  0x8b   :  { %v93_v15 = vld [vmem:[#allocation2] sm:$0xff] }
  0x8c   :  { %v94_v16 = vsel %vm53_vm1, %v93_v15, 0.0 }
  0x8d   :  { %95 = vadd.xlane.f32.xlu1 %v94_v16 }
  0x95   :  { %108 = vadd.xlane.f32.xlu1 %v107_v18 }
 0x100   :  { %v96_v19 = vpop.xlane.xlu1 %95 }
 0x101   :  { %v97_v20 = vrot.slane %v96_v19, 4 }
 0x103   :  { %v98_v21 = vadd.f32 %v97_v20, %v96_v19 }
 0x105   :  { %v99_v22 = vrot.slane %v98_v21, 2 }
 0x107   :  { %v100_v23 = vadd.f32 %v99_v22, %v98_v21 }
 0x108   :  { %v109_v24 = vpop.xlane.xlu1 %108 }
 0x109   :  { %v110_v25 = vrot.slane %v109_v24, 4  ;;  %v101_v26 = vrot.slane %v100_v23, 1 }
 0x10b   :  { %v111_v27 = vadd.f32 %v110_v25, %v109_v24  ;;  %v102_v28 = vadd.f32 %v101_v26, %v100_v23 }
 0x10d   :  { %v112_v29 = vrot.slane %v111_v27, 2  ;;  %161 = vpush %v102_v28 }
 0x10f   :  { %v113_v30 = vadd.f32 %v112_v29, %v111_v27 }
 0x111   :  { %v114_v31 = vrot.slane %v113_v30, 1 }
 0x113   :  { %v115_v32 = vadd.f32 %v114_v31, %v113_v30 }
 0x115   :  { %163 = vpush %v115_v32 }
 0x13e   :  { %s162_s17 = spop %161 }
 0x13f   :  { %105 = sst [smem:[#allocation4]] %s162_s17 }
 0x140   :  { %127 = dma.smem_to_hbm %s200_s18, 16, %s125_s16, [#allocation5]  }
 0x146   :  { %s164_s22 = spop %163 }
 0x147   :  { %118 = sst [smem:[#allocation6]] %s164_s22 }
 0x148   :  { %136 = dma.smem_to_hbm %s201_s23, 16, %s134_s21, [#allocation7]  }
 0x149   :  { %194 = dma.done.wait [#allocation5], 16  }
 0x14a   :  { %195 = vsyncadd [#allocation5], 4294967280 }
 0x14b   :  { %196 = dma.done.wait [#allocation7], 16  }
 0x14c   :  { %197 = vsyncadd [#allocation7], 4294967280 }
 0x14d   :  { %145 = sfence }
 0x14e   :  { %146 = vsyncpa [#allocation5], 1 }
 0x14f   :  { %147 = vsyncpa [#allocation7], 1 }

</bundles_post_ra>
